<compile_context>
chip_gen: v5e
topology: v5e:2x2
jax: 0.10.0
libtpu: 0.0.40
codegen_flags: <defaults>
</compile_context>

<pallas_src>
import functools

import jax
import jax.numpy as jnp
from jax import lax
from jax.experimental import pallas as pl
from jax.experimental.pallas import tpu as pltpu


def _round_up(x, m):
    return (x + m - 1) // m * m


def _cdiv(a, b):
    return -(-a // b)


def _device_kind():
    try:
        return jax.devices()[0].device_kind.lower()
    except Exception:
        return ""


def _triplet_kernel(a_ref, p_ref, n_ref, o_ref, *scratch, margin, block_b,
                    block_d, nb_per_chunk, nd, batch, dim):
    if nd > 1:
        row_acc, total_acc = scratch
    else:
        row_acc, (total_acc,) = None, scratch

    c = pl.program_id(0)                 # chunk (parallel; 2-TC chips)
    i = pl.program_id(1)                 # batch tile within chunk
    d = pl.program_id(2)                 # D tile (reduction, last)
    nb = pl.num_programs(1)

    # Reset the chunk accumulator at the first step of each chunk.
    @pl.when(jnp.logical_and(i == 0, d == 0))
    def _():
        total_acc[...] = jnp.zeros_like(total_acc)

    a = a_ref[...]
    p = p_ref[...]
    n = n_ref[...]
    if a.dtype != jnp.float32:           # bf16 inputs: accumulate in f32
        a = a.astype(jnp.float32)
        p = p.astype(jnp.float32)
        n = n.astype(jnp.float32)

    d_ap = a - p
    d_an = a - n
    per_elem = d_ap * d_ap - d_an * d_an          # (block_b, block_d)

    # Lane mask for a partial final D tile (only emitted if D % block_d != 0).
    if dim % block_d != 0:
        lane = lax.broadcasted_iota(jnp.int32, per_elem.shape, 1)
        per_elem = jnp.where(d * block_d + lane < dim, per_elem, 0.0)

    # Row validity mask (partial / phantom batch blocks — no wrapper padding).
    row0 = (c * nb_per_chunk + i) * block_b
    rid = row0 + lax.broadcasted_iota(jnp.int32, (block_b, 1), 0)
    row_valid = rid < batch

    if nd == 1:
        # Common fast path: one XLU reduce per tile straight into total_acc.
        loss = jnp.maximum(
            jnp.sum(per_elem, axis=1, keepdims=True) + margin, 0.0)
        total_acc[...] += jnp.where(row_valid, loss, 0.0)
    else:
        @pl.when(d == 0)
        def _():
            row_acc[...] = jnp.zeros_like(row_acc)

        # Lane-wise accumulation: fold 128-lane groups with VALU adds; the
        # single cross-lane reduce happens only on the last D tile.
        groups = block_d // 128
        folded = per_elem[:, 0:128]
        for g in range(1, groups):
            folded = folded + per_elem[:, g * 128:(g + 1) * 128]
        row_acc[...] += folded

        @pl.when(d == nd - 1)
        def _():
            s = jnp.sum(row_acc[...], axis=1, keepdims=True)
            loss = jnp.maximum(s + margin, 0.0)
            total_acc[...] += jnp.where(row_valid, loss, 0.0)

    # Single cross-sublane reduce + output store, once per chunk.
    @pl.when(jnp.logical_and(i == nb - 1, d == nd - 1))
    def _():
        s = jnp.sum(total_acc[...])
        o_ref[...] = jnp.broadcast_to(s, o_ref.shape)


def triplet_loss(anchor, positive, negative, margin=50.0, *,
                 block_b=None, block_d=None, num_chunks=None,
                 vmem_limit_bytes=None, input_buffers=None):
    """anchor/positive/negative: (B, D) f32 or bf16. Returns scalar f32 loss."""
    B, D = anchor.shape
    assert positive.shape == (B, D) and negative.shape == (B, D)
    assert anchor.dtype == positive.dtype == negative.dtype
    itemsize = anchor.dtype.itemsize

    kind = _device_kind()
    is_v6e = "v6" in kind
    # Chips with 2 TensorCores per JAX device: v4/v5p (megacore) and v7x.
    multi_tc = any(t in kind for t in ("v7", "tpu7", "v4", "v5p"))

    # ---- D tiling (only kicks in for very wide embeddings) ----
    max_block_d = 2048
    if block_d is None:
        block_d = D if D <= max_block_d else max_block_d
    block_d = min(block_d, D)
    if block_d < D:
        assert block_d % 128 == 0, "D tile must be a multiple of 128 lanes"
    nd = _cdiv(D, block_d)

    # ---- batch tiling: ~4 MiB / 8 MiB (v6e) per input tile ----
    sub = max(8, 32 // itemsize)          # sublane packing: f32->8, bf16->16
    if block_b is None:
        tile_budget = (8 if is_v6e else 4) * 1024 * 1024
        bb = tile_budget // (block_d * itemsize)
        bb = max(sub, (bb // sub) * sub)
        block_b = min(bb, _round_up(B, sub))
    assert block_b % sub == 0, (
        f"block_b must be a multiple of {sub} for dtype {anchor.dtype}")

    nb_total = _cdiv(B, block_b)
    if num_chunks is None:
        num_chunks = 2 if (multi_tc and nb_total >= 2) else 1
    num_chunks = max(1, min(num_chunks, nb_total))
    nb_per_chunk = _cdiv(nb_total, num_chunks)

    # ---- VMEM budget ----
    bufs = 2 if input_buffers is None else int(input_buffers)
    if vmem_limit_bytes is None:
        need = 3 * bufs * block_b * block_d * itemsize      # input buffers
        need += 2 * block_b * 512 + (4 << 20)               # scratch + slack
        vmem_limit_bytes = max((80 if is_v6e else 48) << 20, need)

    # Clamp phantom block indices (from num_chunks rounding) into range;
    # their rows are >= B so the in-kernel row mask zeroes them out.
    def imap(c, i, d):
        return (jnp.minimum(c * nb_per_chunk + i, nb_total - 1), d)

    if input_buffers is None:
        in_spec = pl.BlockSpec((block_b, block_d), imap)
    else:
        in_spec = pl.BlockSpec((block_b, block_d), imap,
                               pipeline_mode=pl.Buffered(bufs))
    # One (8,128)-aligned output tile per chunk; the scalar lives at [c,0,0].
    out_spec = pl.BlockSpec((1, 8, 128), lambda c, i, d: (c, 0, 0))

    scratch_shapes = [pltpu.VMEM((block_b, 1), jnp.float32)]      # total_acc
    if nd > 1:
        scratch_shapes.insert(0, pltpu.VMEM((block_b, 128), jnp.float32))

    kernel = functools.partial(
        _triplet_kernel, margin=float(margin), block_b=block_b,
        block_d=block_d, nb_per_chunk=nb_per_chunk, nd=nd, batch=B, dim=D)

    partials = pl.pallas_call(
        kernel,
        out_shape=jax.ShapeDtypeStruct((num_chunks, 8, 128), jnp.float32),
        grid_spec=pltpu.PrefetchScalarGridSpec(
            num_scalar_prefetch=0,
            grid=(num_chunks, nb_per_chunk, nd),
            in_specs=[in_spec, in_spec, in_spec],
            out_specs=out_spec,
            scratch_shapes=scratch_shapes),
        compiler_params=pltpu.CompilerParams(
            dimension_semantics=("parallel", "arbitrary", "arbitrary"),
            vmem_limit_bytes=int(vmem_limit_bytes)),
    )(anchor, positive, negative)
    return jnp.sum(partials[:, 0, 0])


def triplet_loss_ref(anchor, positive, negative, margin=50.0):
    a = anchor.astype(jnp.float32)
    p = positive.astype(jnp.float32)
    n = negative.astype(jnp.float32)
    ap = jnp.sum((a - p) ** 2, axis=1)
    an = jnp.sum((a - n) ** 2, axis=1)
    return jnp.sum(jnp.maximum(ap - an + margin, 0.0))


if __name__ == "__main__":
    key = jax.random.PRNGKey(0)

    # ---- main small test (default tiling, nd == 1 fast path) ----
    k_a, k_p, k_n = jax.random.split(key, 3)
    B, D = 16, 128
    anchor = jax.random.normal(k_a, (B, D), dtype=jnp.float32)
    positive = jax.random.normal(k_p, (B, D), dtype=jnp.float32)
    negative = jax.random.normal(k_n, (B, D), dtype=jnp.float32)
    out = jax.block_until_ready(triplet_loss(anchor, positive, negative, margin=50.0))
    ref = triplet_loss_ref(anchor, positive, negative, margin=50.0)
    assert jnp.allclose(out, ref, rtol=1e-5, atol=1e-2), (out, ref)

    # ---- ragged batch + forced D-tiling + 2 chunks (partial & phantom blocks, no pad) ----
    k_a2, k_p2, k_n2 = jax.random.split(jax.random.PRNGKey(1), 3)
    B2, D2 = 20, 384
    a2 = jax.random.normal(k_a2, (B2, D2), dtype=jnp.float32)
    p2 = jax.random.normal(k_p2, (B2, D2), dtype=jnp.float32)
    n2 = jax.random.normal(k_n2, (B2, D2), dtype=jnp.float32)
    out2 = jax.block_until_ready(
        triplet_loss(a2, p2, n2, margin=5.0, block_b=8, block_d=128, num_chunks=2))
    ref2 = triplet_loss_ref(a2, p2, n2, margin=5.0)
    assert jnp.allclose(out2, ref2, rtol=1e-5, atol=1e-2), (out2, ref2)

    # ---- same data, default tiling (single partial block, row masking) ----
    out3 = jax.block_until_ready(triplet_loss(a2, p2, n2, margin=5.0))
    assert jnp.allclose(out3, ref2, rtol=1e-5, atol=1e-2), (out3, ref2)

    # ---- bf16 inputs (dtype-aware block_b, 16-row sublane multiple) ----
    k_a3, k_p3, k_n3 = jax.random.split(jax.random.PRNGKey(2), 3)
    B3, D3 = 24, 256
    a3 = jax.random.normal(k_a3, (B3, D3), dtype=jnp.float32).astype(jnp.bfloat16)
    p3 = jax.random.normal(k_p3, (B3, D3), dtype=jnp.float32).astype(jnp.bfloat16)
    n3 = jax.random.normal(k_n3, (B3, D3), dtype=jnp.float32).astype(jnp.bfloat16)
    out4 = jax.block_until_ready(triplet_loss(a3, p3, n3, margin=10.0))
    ref4 = triplet_loss_ref(a3, p3, n3, margin=10.0)
    assert jnp.allclose(out4, ref4, rtol=1e-4, atol=5e-2), (out4, ref4)

    # ---- D not a multiple of 128 with forced D tiling (lane mask path) ----
    k_a4, k_p4, k_n4 = jax.random.split(jax.random.PRNGKey(3), 3)
    B4, D4 = 12, 200
    a4 = jax.random.normal(k_a4, (B4, D4), dtype=jnp.float32)
    p4 = jax.random.normal(k_p4, (B4, D4), dtype=jnp.float32)
    n4 = jax.random.normal(k_n4, (B4, D4), dtype=jnp.float32)
    out5 = jax.block_until_ready(
        triplet_loss(a4, p4, n4, margin=1.0, block_b=8, block_d=128))
    ref5 = triplet_loss_ref(a4, p4, n4, margin=1.0)
    assert jnp.allclose(out5, ref5, rtol=1e-5, atol=1e-2), (out5, ref5)

    print("KERNEL_OK")
</pallas_src>

<mosaic_0001>
module attributes {stable_mosaic.version = 11 : i64} {
  func.func @_triplet_kernel(%arg0: i32, %arg1: i32, %arg2: i32, %arg3: memref<16x128xf32, #tpu.memory_space<vmem>>, %arg4: memref<16x128xf32, #tpu.memory_space<vmem>>, %arg5: memref<16x128xf32, #tpu.memory_space<vmem>>, %arg6: memref<1x8x128xf32, #tpu.memory_space<vmem>>, %arg7: memref<16x1xf32, #tpu.memory_space<vmem>>) attributes {dimension_semantics = [#tpu.dimension_semantics<parallel>, #tpu.dimension_semantics<arbitrary>, #tpu.dimension_semantics<arbitrary>], iteration_bounds = array<i64: 1, 1, 1>, scalar_prefetch = 0 : i64, scratch_operands = 1 : i64, tpu.core_type = #tpu.core_type<tc>, window_params = [{transform_indices = @transform_0, window_bounds = array<i64: 16, 128>}, {transform_indices = @transform_1, window_bounds = array<i64: 16, 128>}, {transform_indices = @transform_2, window_bounds = array<i64: 16, 128>}, {transform_indices = @transform_3, window_bounds = array<i64: 1, 8, 128>}]} {
    %c0_i32 = arith.constant 0 : i32
    %0 = arith.cmpi eq, %arg1, %c0_i32 : i32
    %c0_i32_0 = arith.constant 0 : i32
    %1 = arith.cmpi eq, %arg2, %c0_i32_0 : i32
    %2 = arith.andi %0, %1 : i1
    %3 = arith.extui %2 : i1 to i32
    %c0_i32_1 = arith.constant 0 : i32
    %4 = arith.cmpi ne, %3, %c0_i32_1 : i32
    scf.if %4 {
      %cst_18 = arith.constant 0.000000e+00 : f32
      %37 = vector.broadcast %cst_18 : f32 to vector<16x1xf32>
      %c0_19 = arith.constant 0 : index
      %c0_20 = arith.constant 0 : index
      %38 = vector.load %arg7[%c0_19, %c0_20] : memref<16x1xf32, #tpu.memory_space<vmem>>, vector<16x1xf32>
      tpu.vector_store %arg7[%c0_19, %c0_20], %37 {strides = array<i32>} : memref<16x1xf32, #tpu.memory_space<vmem>>, vector<16x1xf32>,
    } else {
    }
    %c0 = arith.constant 0 : index
    %c0_2 = arith.constant 0 : index
    %5 = vector.load %arg3[%c0, %c0_2] : memref<16x128xf32, #tpu.memory_space<vmem>>, vector<16x128xf32>
    %c0_3 = arith.constant 0 : index
    %c0_4 = arith.constant 0 : index
    %6 = vector.load %arg4[%c0_3, %c0_4] : memref<16x128xf32, #tpu.memory_space<vmem>>, vector<16x128xf32>
    %c0_5 = arith.constant 0 : index
    %c0_6 = arith.constant 0 : index
    %7 = vector.load %arg5[%c0_5, %c0_6] : memref<16x128xf32, #tpu.memory_space<vmem>>, vector<16x128xf32>
    %8 = arith.subf %5, %6 : vector<16x128xf32>
    %9 = arith.subf %5, %7 : vector<16x128xf32>
    %10 = arith.mulf %8, %8 : vector<16x128xf32>
    %11 = arith.mulf %9, %9 : vector<16x128xf32>
    %12 = arith.subf %10, %11 : vector<16x128xf32>
    %c1_i32 = arith.constant 1 : i32
    %13 = arith.muli %arg0, %c1_i32 : i32
    %14 = arith.addi %13, %arg1 : i32
    %c16_i32 = arith.constant 16 : i32
    %15 = arith.muli %14, %c16_i32 : i32
    %16 = tpu.iota {dimensions = array<i32: 0>} : vector<16x1xi32>
    %17 = vector.broadcast %15 : i32 to vector<16x1xi32>
    %18 = arith.addi %17, %16 : vector<16x1xi32>
    %c16_i32_7 = arith.constant 16 : i32
    %19 = vector.broadcast %c16_i32_7 : i32 to vector<16x1xi32>
    %20 = arith.cmpi slt, %18, %19 : vector<16x1xi32>
    %cst = arith.constant dense<0.000000e+00> : vector<16xf32>
    %21 = vector.multi_reduction <add>, %12, %cst [1] : vector<16x128xf32> to vector<16xf32>
    %22 = vector.shape_cast %21 : vector<16xf32> to vector<16x1xf32>
    %cst_8 = arith.constant 5.000000e+01 : f32
    %23 = vector.broadcast %cst_8 : f32 to vector<16x1xf32>
    %24 = arith.addf %22, %23 : vector<16x1xf32>
    %cst_9 = arith.constant 0.000000e+00 : f32
    %25 = vector.broadcast %cst_9 : f32 to vector<16x1xf32>
    %26 = arith.maximumf %24, %25 : vector<16x1xf32>
    %c0_10 = arith.constant 0 : index
    %c0_11 = arith.constant 0 : index
    %27 = vector.load %arg7[%c0_10, %c0_11] : memref<16x1xf32, #tpu.memory_space<vmem>>, vector<16x1xf32>
    %cst_12 = arith.constant 0.000000e+00 : f32
    %28 = vector.broadcast %cst_12 : f32 to vector<16x1xf32>
    %29 = arith.select %20, %26, %28 : vector<16x1xi1>, vector<16x1xf32>
    %30 = arith.addf %27, %29 : vector<16x1xf32>
    %c0_13 = arith.constant 0 : index
    %c0_14 = arith.constant 0 : index
    %31 = vector.load %arg7[%c0_13, %c0_14] : memref<16x1xf32, #tpu.memory_space<vmem>>, vector<16x1xf32>
    tpu.vector_store %arg7[%c0_13, %c0_14], %30 {strides = array<i32>} : memref<16x1xf32, #tpu.memory_space<vmem>>, vector<16x1xf32>,
    %c0_i32_15 = arith.constant 0 : i32
    %32 = arith.cmpi eq, %arg1, %c0_i32_15 : i32
    %c0_i32_16 = arith.constant 0 : i32
    %33 = arith.cmpi eq, %arg2, %c0_i32_16 : i32
    %34 = arith.andi %32, %33 : i1
    %35 = arith.extui %34 : i1 to i32
    %c0_i32_17 = arith.constant 0 : i32
    %36 = arith.cmpi ne, %35, %c0_i32_17 : i32
    scf.if %36 {
      %c0_18 = arith.constant 0 : index
      %c0_19 = arith.constant 0 : index
      %37 = vector.load %arg7[%c0_18, %c0_19] : memref<16x1xf32, #tpu.memory_space<vmem>>, vector<16x1xf32>
      %38 = vector.shape_cast %37 : vector<16x1xf32> to vector<1x16x1xf32>
      %cst_20 = arith.constant dense<0.000000e+00> : vector<1xf32>
      %39 = vector.multi_reduction <add>, %38, %cst_20 [1, 2] : vector<1x16x1xf32> to vector<1xf32>
      %40 = vector.shape_cast %39 : vector<1xf32> to vector<1x1x1xf32>
      %41 = vector.extract %40[0, 0, 0] : f32 from vector<1x1x1xf32>
      %42 = vector.broadcast %41 : f32 to vector<1x8x128xf32>
      %c0_21 = arith.constant 0 : index
      %c0_22 = arith.constant 0 : index
      %c0_23 = arith.constant 0 : index
      %43 = vector.load %arg6[%c0_21, %c0_22, %c0_23] : memref<1x8x128xf32, #tpu.memory_space<vmem>>, vector<1x8x128xf32>
      tpu.vector_store %arg6[%c0_21, %c0_22, %c0_23], %42 {strides = array<i32>} : memref<1x8x128xf32, #tpu.memory_space<vmem>>, vector<1x8x128xf32>,
    } else {
    }
    return
  }
  func.func @transform_0(%arg0: i32, %arg1: i32, %arg2: i32) -> (i32, i32) {
    %c1_i32 = arith.constant 1 : i32
    %0 = arith.muli %arg0, %c1_i32 : i32
    %1 = arith.addi %0, %arg1 : i32
    %c0_i32 = arith.constant 0 : i32
    %2 = arith.minsi %1, %c0_i32 : i32
    %c0_i32_0 = arith.constant 0 : i32
    return %2, %arg2 : i32, i32
  }
  func.func @transform_1(%arg0: i32, %arg1: i32, %arg2: i32) -> (i32, i32) {
    %c1_i32 = arith.constant 1 : i32
    %0 = arith.muli %arg0, %c1_i32 : i32
    %1 = arith.addi %0, %arg1 : i32
    %c0_i32 = arith.constant 0 : i32
    %2 = arith.minsi %1, %c0_i32 : i32
    %c0_i32_0 = arith.constant 0 : i32
    return %2, %arg2 : i32, i32
  }
  func.func @transform_2(%arg0: i32, %arg1: i32, %arg2: i32) -> (i32, i32) {
    %c1_i32 = arith.constant 1 : i32
    %0 = arith.muli %arg0, %c1_i32 : i32
    %1 = arith.addi %0, %arg1 : i32
    %c0_i32 = arith.constant 0 : i32
    %2 = arith.minsi %1, %c0_i32 : i32
    %c0_i32_0 = arith.constant 0 : i32
    return %2, %arg2 : i32, i32
  }
  func.func @transform_3(%arg0: i32, %arg1: i32, %arg2: i32) -> (i32, i32, i32) {
    %c0_i32 = arith.constant 0 : i32
    %c0_i32_0 = arith.constant 0 : i32
    %c0_i32_1 = arith.constant 0 : i32
    return %arg0, %c0_i32, %c0_i32_0 : i32, i32, i32
  }
}

</mosaic_0001>

<bundles_post_ra>
// kernel: tpu_custom_call.1
= control target key start
LH: loop header
LB: loop body
LE: loop exit
PB: predicated region body
PF: predicated region fallthrough
CT: control target
= control target key end

     0   :  { %8 = vsyncpa [#allocation4], 0  ;;  %s342_s0 = inlined_call_operand.hbm [shape: f32[16,128], index: 0, kind: input, shape index: {}]   ;;  %s343_s1 = inlined_call_operand.hbm [shape: f32[16,128], index: 1, kind: input, shape index: {}]   ;;  %s344_s2 = inlined_call_operand.hbm [shape: f32[16,128], index: 2, kind: input, shape index: {}]   ;;  %s345_s3 = inlined_call_operand.hbm [shape: f32[1,8,128], index: 3, kind: output, shape index: {}]  }
   0x1   :  { %9 = vsyncpa [#allocation7], 0 }
   0x2   :  { %10 = vsyncpa [#allocation5], 0  ;;  %s40_s14 = sshll.u32 %s343_s1, 4  ;;  %s297_s15 = smov [#allocation6]   ;;  %s41_s14 = int_to_ptr.hbm [resolvable:$true] %s40_s14 }
   0x3   :  { %s42_s16 = sshll.u32 %s297_s15, 4  ;;  %s21_s19 = sshll.u32 %s342_s0, 4  ;;  %s43_s16 = int_to_ptr.vmem [resolvable:$true] %s42_s16  ;;  %s22_s19 = int_to_ptr.hbm [resolvable:$true] %s21_s19 }
   0x4   :  { %s298_s20 = smov 128   ;;  %s299_s21 = smov 8  }
   0x5   :  { %48 = dma.hbm_to_vmem [thread:$0]  %s41_s14, 256, %s43_s16, [#allocation7], %s298_s20, %s298_s20, %s299_s21  }
   0x6   :  { %s300_s22 = smov [#allocation3]   ;;  %s59_s26 = sshll.u32 %s344_s2, 4  ;;  %s60_s26 = int_to_ptr.hbm [resolvable:$true] %s59_s26 }
   0x7   :  { %s23_s23 = sshll.u32 %s300_s22, 4  ;;  %s301_s1 = smov [#allocation8]   ;;  %s24_s23 = int_to_ptr.vmem [resolvable:$true] %s23_s23 }
   0x8   :  { %29 = dma.hbm_to_vmem [thread:$0]  %s22_s19, 256, %s24_s23, [#allocation4], %s298_s20, %s298_s20, %s299_s21  }
   0x9   :  { %s61_s27 = sshll.u32 %s301_s1, 4  ;;  %s62_s27 = int_to_ptr.vmem [resolvable:$true] %s61_s27 }
   0xa   :  { %67 = dma.hbm_to_vmem [thread:$0]  %s60_s26, 256, %s62_s27, [#allocation7], %s298_s20, %s298_s20, %s299_s21  }
   0xb   :  { %291 = dma.done.wait [#allocation4], 256  }
   0xc   :  { %292 = vsyncadd [#allocation4], 4294967040 }
   0xd   :  { %293 = dma.done.wait [#allocation7], 512  }
   0xe   :  { %294 = vsyncadd [#allocation7], 4294966784  ;;  %vm98_vm0 = vcmask 7168   ;;  %v302_v0 = vmov 0.0   ;;  %v101_v1 = vld [vmem:[#allocation3] sm:$0xff]  ;;  %v103_v2 = vld [vmem:[#allocation6] sm:$0xff] }
   0xf   :  { %99 = vst.msk [vmem:[#allocation2] sm:$0xff] %vm98_vm0, %v302_v0  ;;  %v105_v3 = vld [vmem:[#allocation8] sm:$0xff]  ;;  %v107_v4 = vsub.f32 %v101_v1, %v103_v2  ;;  %v102_v6 = vld [vmem:[#allocation3 + $0x8] sm:$0xff]  ;;  %v104_v7 = vld [vmem:[#allocation6 + $0x8] sm:$0xff]  ;;  %s303_s0 = smov [#allocation9]   ;;  %s169_s30 = sshll.u32 %s345_s3, 4  ;;  %s170_s30 = int_to_ptr.hbm [resolvable:$true] %s169_s30 }
  0x10   :  { %100 = vst.msk [vmem:[#allocation2 + $0x8] sm:$0xff] %vm98_vm0, %v302_v0  ;;  %v109_v5 = vsub.f32 %v101_v1, %v105_v3  ;;  %v106_v8 = vld [vmem:[#allocation8 + $0x8] sm:$0xff]  ;;  %v108_v11 = vsub.f32 %v102_v6, %v104_v7  ;;  %s167_s2 = sshll.u32 %s303_s0, 4  ;;  %s168_s2 = int_to_ptr.vmem [resolvable:$true] %s167_s2 }
  0x11   :  { %v111_v9 = vmul.f32 %v107_v4, %v107_v4  ;;  %v110_v12 = vsub.f32 %v102_v6, %v106_v8 }
  0x12   :  { %v113_v10 = vmul.f32 %v109_v5, %v109_v5  ;;  %v112_v14 = vmul.f32 %v108_v11, %v108_v11 }
  0x13   :  { %v114_v15 = vmul.f32 %v110_v12, %v110_v12 }
  0x14   :  { %v115_v13 = vsub.f32 %v111_v9, %v113_v10 }
  0x15   :  { %v116_v16 = vsub.f32 %v112_v14, %v114_v15 }
  0x16   :  { %127 = vadd.xlane.f32.xlu0 %v115_v13  ;;  %v135_v19 = vld [vmem:[#allocation2] sm:$0xff] }
  0x17   :  { %v136_v24 = vld [vmem:[#allocation2 + $0x8] sm:$0xff] }
  0x1e   :  { %129 = vadd.xlane.f32.xlu0 %v116_v16 }
  0x89   :  { %v128_v17 = vpop.xlane.xlu0 %127 }
  0x8a   :  { %v131_v18 = vadd.f32 50.0, %v128_v17 }
  0x8c   :  { %v133_v20 = vmax.f32 %v131_v18, 0.0 }
  0x8e   :  { %v139_v21 = vadd.f32 %v135_v19, %v133_v20 }
  0x90   :  { %142 = vst.msk [vmem:[#allocation2] sm:$0xff] %vm98_vm0, %v139_v21 }
  0x91   :  { %v130_v22 = vpop.xlane.xlu0 %129 }
  0x92   :  { %v132_v23 = vadd.f32 50.0, %v130_v22 }
  0x94   :  { %v134_v25 = vmax.f32 %v132_v23, 0.0 }
  0x96   :  { %v140_v26 = vadd.f32 %v136_v24, %v134_v25 }
  0x97   :  { %v146_v27 = vld [vmem:[#allocation2] sm:$0xff] }
  0x98   :  { %143 = vst.msk [vmem:[#allocation2 + $0x8] sm:$0xff] %vm98_vm0, %v140_v26  ;;  %v148_v29 = vsel %vm98_vm0, %v146_v27, 0.0 }
  0x9f   :  { %v147_v28 = vld [vmem:[#allocation2 + $0x8] sm:$0xff] }
  0xa0   :  { %v149_v30 = vsel %vm98_vm0, %v147_v28, 0.0 }
  0xa1   :  { %v150_v31 = vadd.f32 %v149_v30, %v148_v29 }
  0xa3   :  { %151 = vadd.xlane.f32.xlu1 %v150_v31 }
 0x116   :  { %v152_v32 = vpop.xlane.xlu1 %151 }
 0x117   :  { %v153_v33 = vrot.slane %v152_v32, 4 }
 0x119   :  { %v154_v34 = vadd.f32 %v153_v33, %v152_v32 }
 0x11b   :  { %v155_v35 = vrot.slane %v154_v34, 2 }
 0x11d   :  { %v156_v36 = vadd.f32 %v155_v35, %v154_v34 }
 0x11f   :  { %v157_v37 = vrot.slane %v156_v36, 1 }
 0x121   :  { %v158_v38 = vadd.f32 %v157_v37, %v156_v36 }
 0x123   :  { %186 = vpush %v158_v38 }
 0x154   :  { %s187_s4 = spop %186 }
 0x155   :  { %v160_v39 = vstv %s187_s4 }
 0x156   :  { %161 = vst [vmem:[#allocation9] sm:$0xff] %v160_v39 }
 0x157   :  { %172 = dma.vmem_to_hbm [thread:$0]  %s168_s2, 128, %s170_s30, [#allocation5]  }
 0x158   :  { %295 = dma.done.wait [#allocation5], 128  }
 0x159   :  { %296 = vsyncadd [#allocation5], 4294967168 }
 0x15a   :  { %177 = vsyncpa [#allocation4], 1 }
 0x15b   :  { %178 = vsyncpa [#allocation7], 1 }
 0x15c   :  { %179 = vsyncpa [#allocation5], 1 }

</bundles_post_ra>
